<compile_context>
chip_gen: v7x
topology: tpu7x:2x2x1
jax: 0.10.0
libtpu: 0.0.40
codegen_flags: <defaults>
</compile_context>

<pallas_src>
import math

import jax
import jax.numpy as jnp
from jax.experimental import pallas as pl
from jax.experimental.pallas import tpu as pltpu

D_MODEL = 32
NUM_HEADS = 4
D_K = D_MODEL // NUM_HEADS
D_FF = 64
EPS = 1e-5          # nn.LayerNorm default
TM_MAX = 512        # row-tile size for large batches (rows are independent at S == 1)


# ----------------------------- helpers (traced inside the kernel) ---------------------------

def _layernorm(y, gamma, beta):
    mu = jnp.mean(y, axis=-1, keepdims=True)
    var = jnp.mean((y - mu) ** 2, axis=-1, keepdims=True)
    return (y - mu) * jax.lax.rsqrt(var + EPS) * gamma + beta


def _gelu(x):
    c = math.sqrt(2.0 / math.pi)
    return 0.5 * x * (1.0 + jnp.tanh(c * (x + 0.044715 * x * x * x)))


def _mm(a_f32, w_bf16):
    # activation cast to bf16 at use; weights are already bf16; f32 accumulation on MXU.
    return jnp.dot(a_f32.astype(jnp.bfloat16), w_bf16, preferred_element_type=jnp.float32)


# ------------------------------------ fused kernel ------------------------------------------

def _fused_block_kernel(x_ref, w_fold_ref, w1_ref, w2_ref, w3_ref, b_ff1_ref, p32_ref,
                        o_ref):
    x = x_ref[...]                      # (TM, 32) f32 activations
    w_fold = w_fold_ref[...]            # (32, 64) bf16  == perm(V1,V2) @ W_o, both positions
    w1 = w1_ref[...]                    # (32, 64) bf16
    w2 = w2_ref[...]                    # (64, 32) bf16
    w3 = w3_ref[...]                    # (32, 32) bf16
    b_ff1 = b_ff1_ref[...]              # (1, 64)  f32

    p32 = p32_ref[...]                  # (10, 32) f32 packed small params
    g_attn, be_attn = p32[2:3, :], p32[3:4, :]
    g1, be1 = p32[4:5, :], p32[5:6, :]
    g2, be2 = p32[6:7, :], p32[7:8, :]
    b_ff2, b_ff3 = p32[8:9, :], p32[9:10, :]

    # Attention (S == 1): softmax over one key == 1, so context == permuted V projection;
    # the permutation + output projection are folded into w_fold -> ONE matmul gives the
    # pre-norm attention output for BOTH output positions (lanes 0:32 and 32:64).
    attn_pre = _mm(x, w_fold)           # (TM, 64)

    outs = []
    for p in range(2):                  # static unroll over the two output positions
        a = _layernorm(attn_pre[:, D_MODEL * p:D_MODEL * (p + 1)] + p32[p:p + 1, :],
                       g_attn, be_attn)                     # ComplexAttention.norm
        y = x + a                                            # residual (dropout = identity)
        x1 = _layernorm(y, g1, be1)                          # norm1
        h = _gelu(_mm(x1, w1) + b_ff1)                       # Linear(32,64) + GELU
        h = _gelu(_mm(h, w2) + b_ff2)                        # Linear(64,32) + GELU
        ff = _mm(h, w3) + b_ff3                              # Linear(32,32)
        outs.append(_layernorm(x1 + ff, g2, be2))            # residual + norm2

    # single lane-dense (TM, 64) store: lanes [0:32] = position 0, [32:64] = position 1
    o_ref[...] = jnp.concatenate(outs, axis=1).astype(o_ref.dtype)


# ----------------------------------- wrapper / params ---------------------------------------

def init_params(key):
    keys = jax.random.split(key, 6)

    def linear(k, fan_in, fan_out):
        kw, kb = jax.random.split(k)
        bound = 1.0 / math.sqrt(fan_in)
        w = jax.random.uniform(kw, (fan_in, fan_out), jnp.float32, -bound, bound)
        b = jax.random.uniform(kb, (1, fan_out), jnp.float32, -bound, bound)
        return w, b

    # Only the V branches + output projection survive the S==1 specialization (the Q/K
    # projections never influence the output: softmax over a single key == 1).
    w_v1, b_v1 = linear(keys[0], D_MODEL, D_MODEL)
    w_v2, b_v2 = linear(keys[1], D_MODEL, D_MODEL)
    w_o, b_o = linear(keys[2], D_MODEL, D_MODEL)
    w_ff1, b_ff1 = linear(keys[3], D_MODEL, D_FF)
    w_ff2, b_ff2 = linear(keys[4], D_FF, D_FF // 2)
    w_ff3, b_ff3 = linear(keys[5], D_FF // 2, D_MODEL)

    # head-interleave permutation (torch.cat + transpose + view) folded into the V weights:
    # output position 0 lanes = [v1_h0 | v2_h0 | v1_h1 | v2_h1], position 1 = heads 2, 3.
    def perm_cols(a1, a2, heads):
        return jnp.concatenate(
            [c for h in heads for c in (a1[:, h * D_K:(h + 1) * D_K],
                                        a2[:, h * D_K:(h + 1) * D_K])], axis=1)

    folded_w, folded_b = [], []
    for heads in ((0, 1), (2, 3)):
        wv_p = perm_cols(w_v1, w_v2, heads)            # (32, 32)
        bv_p = perm_cols(b_v1, b_v2, heads)            # (1, 32)
        folded_w.append(wv_p @ w_o)                    # fold output projection too
        folded_b.append(bv_p @ w_o + b_o)
    w_fold = jnp.concatenate(folded_w, axis=1)         # (32, 64)

    ones = jnp.ones((1, D_MODEL), jnp.float32)
    zeros = jnp.zeros((1, D_MODEL), jnp.float32)
    # all 32-lane small params packed into one array -> one DMA / one VMEM buffer
    p32 = jnp.concatenate([
        folded_b[0], folded_b[1],       # 0: attn bias pos0   1: attn bias pos1
        ones, zeros,                    # 2: gamma_attn       3: beta_attn
        ones, zeros,                    # 4: gamma1           5: beta1
        ones, zeros,                    # 6: gamma2           7: beta2
        b_ff2, b_ff3,                   # 8: b_ff2            9: b_ff3
    ], axis=0)                          # (10, 32) f32

    bf16 = lambda w: w.astype(jnp.bfloat16)   # MXU fast path, halves weight DMA bytes
    return dict(w_fold=bf16(w_fold), w_ff1=bf16(w_ff1), w_ff2=bf16(w_ff2),
                w_ff3=bf16(w_ff3), b_ff1=b_ff1, p32=p32)


def enhanced_transformer_block(params, x):
    B, S, D = x.shape
    assert D == D_MODEL
    # The reference residual `x + attn_output` (attention output has seq 2*S) only
    # broadcasts when S == 1 — same constraint as the PyTorch module itself.
    assert S == 1, "EnhancedTransformerBlock (reference semantics) requires seq_len == 1"

    rows = B * S
    x2d = x.reshape(rows, D)
    tm = rows if rows <= TM_MAX else TM_MAX
    grid = (pl.cdiv(rows, tm),)

    weights = (params["w_fold"], params["w_ff1"], params["w_ff2"], params["w_ff3"],
               params["b_ff1"], params["p32"])

    def resident(shape):                    # weights/params: DMA'd once, stay in VMEM
        return pl.BlockSpec(shape, lambda i: (0, 0))

    out2d = pl.pallas_call(
        _fused_block_kernel,
        out_shape=jax.ShapeDtypeStruct((rows, 2 * D), jnp.float32),
        grid=grid,
        in_specs=[pl.BlockSpec((tm, D), lambda i: (i, 0))]
                 + [resident(w.shape) for w in weights],
        out_specs=pl.BlockSpec((tm, 2 * D), lambda i: (i, 0)),
        compiler_params=pltpu.CompilerParams(dimension_semantics=("parallel",)),
    )(x2d, *weights)

    # lanes [0:32] = output position 0, [32:64] = position 1 -> contiguous reshape only.
    return out2d.reshape(B, 2 * S, D)


if __name__ == "__main__":
    key = jax.random.PRNGKey(0)
    pkey, xkey = jax.random.split(key)
    params = init_params(pkey)

    # seq=1 is required for the reference residual broadcast (attention output has seq 2*S).
    B, S = 2, 1
    x = jax.random.normal(xkey, (B, S, D_MODEL), jnp.float32)

    out = jax.jit(enhanced_transformer_block)(params, x)
    out = jax.block_until_ready(out)
    assert out.shape == (B, 2 * S, D_MODEL), out.shape
    assert bool(jnp.all(jnp.isfinite(out)))
    print("KERNEL_OK")
</pallas_src>

<mosaic_0001>
module attributes {stable_mosaic.version = 11 : i64} {
  func.func @_fused_block_kernel(%arg0: i32, %arg1: memref<2x32xf32, #tpu.memory_space<vmem>>, %arg2: memref<32x64xbf16, #tpu.memory_space<vmem>>, %arg3: memref<32x64xbf16, #tpu.memory_space<vmem>>, %arg4: memref<64x32xbf16, #tpu.memory_space<vmem>>, %arg5: memref<32x32xbf16, #tpu.memory_space<vmem>>, %arg6: memref<1x64xf32, #tpu.memory_space<vmem>>, %arg7: memref<10x32xf32, #tpu.memory_space<vmem>>, %arg8: memref<2x64xf32, #tpu.memory_space<vmem>>) attributes {dimension_semantics = [#tpu.dimension_semantics<parallel>], iteration_bounds = array<i64: 1>, scalar_prefetch = 0 : i64, scratch_operands = 0 : i64, tpu.core_type = #tpu.core_type<tc>, window_params = [{transform_indices = @transform_0, window_bounds = array<i64: 2, 32>}, {pipeline_mode = #tpu.pipeline_mode<synchronous>, transform_indices = @transform_1, window_bounds = array<i64: 32, 64>}, {pipeline_mode = #tpu.pipeline_mode<synchronous>, transform_indices = @transform_2, window_bounds = array<i64: 32, 64>}, {pipeline_mode = #tpu.pipeline_mode<synchronous>, transform_indices = @transform_3, window_bounds = array<i64: 64, 32>}, {pipeline_mode = #tpu.pipeline_mode<synchronous>, transform_indices = @transform_4, window_bounds = array<i64: 32, 32>}, {pipeline_mode = #tpu.pipeline_mode<synchronous>, transform_indices = @transform_5, window_bounds = array<i64: 1, 64>}, {pipeline_mode = #tpu.pipeline_mode<synchronous>, transform_indices = @transform_6, window_bounds = array<i64: 10, 32>}, {transform_indices = @transform_7, window_bounds = array<i64: 2, 64>}]} {
    %c0 = arith.constant 0 : index
    %c0_0 = arith.constant 0 : index
    %0 = vector.load %arg1[%c0, %c0_0] : memref<2x32xf32, #tpu.memory_space<vmem>>, vector<2x32xf32>
    %c0_1 = arith.constant 0 : index
    %c0_2 = arith.constant 0 : index
    %1 = vector.load %arg2[%c0_1, %c0_2] : memref<32x64xbf16, #tpu.memory_space<vmem>>, vector<32x64xbf16>
    %c0_3 = arith.constant 0 : index
    %c0_4 = arith.constant 0 : index
    %2 = vector.load %arg3[%c0_3, %c0_4] : memref<32x64xbf16, #tpu.memory_space<vmem>>, vector<32x64xbf16>
    %c0_5 = arith.constant 0 : index
    %c0_6 = arith.constant 0 : index
    %3 = vector.load %arg4[%c0_5, %c0_6] : memref<64x32xbf16, #tpu.memory_space<vmem>>, vector<64x32xbf16>
    %c0_7 = arith.constant 0 : index
    %c0_8 = arith.constant 0 : index
    %4 = vector.load %arg5[%c0_7, %c0_8] : memref<32x32xbf16, #tpu.memory_space<vmem>>, vector<32x32xbf16>
    %c0_9 = arith.constant 0 : index
    %c0_10 = arith.constant 0 : index
    %5 = vector.load %arg6[%c0_9, %c0_10] : memref<1x64xf32, #tpu.memory_space<vmem>>, vector<1x64xf32>
    %c0_11 = arith.constant 0 : index
    %c0_12 = arith.constant 0 : index
    %6 = vector.load %arg7[%c0_11, %c0_12] : memref<10x32xf32, #tpu.memory_space<vmem>>, vector<10x32xf32>
    %7 = vector.extract_strided_slice %6 {offsets = [2, 0], sizes = [1, 32], strides = [1, 1]} : vector<10x32xf32> to vector<1x32xf32>
    %8 = vector.extract_strided_slice %6 {offsets = [3, 0], sizes = [1, 32], strides = [1, 1]} : vector<10x32xf32> to vector<1x32xf32>
    %9 = vector.extract_strided_slice %6 {offsets = [4, 0], sizes = [1, 32], strides = [1, 1]} : vector<10x32xf32> to vector<1x32xf32>
    %10 = vector.extract_strided_slice %6 {offsets = [5, 0], sizes = [1, 32], strides = [1, 1]} : vector<10x32xf32> to vector<1x32xf32>
    %11 = vector.extract_strided_slice %6 {offsets = [6, 0], sizes = [1, 32], strides = [1, 1]} : vector<10x32xf32> to vector<1x32xf32>
    %12 = vector.extract_strided_slice %6 {offsets = [7, 0], sizes = [1, 32], strides = [1, 1]} : vector<10x32xf32> to vector<1x32xf32>
    %13 = vector.extract_strided_slice %6 {offsets = [8, 0], sizes = [1, 32], strides = [1, 1]} : vector<10x32xf32> to vector<1x32xf32>
    %14 = vector.extract_strided_slice %6 {offsets = [9, 0], sizes = [1, 32], strides = [1, 1]} : vector<10x32xf32> to vector<1x32xf32>
    %15 = arith.truncf %0 : vector<2x32xf32> to vector<2x32xbf16>
    %cst = arith.constant dense<0.000000e+00> : vector<2x64xf32>
    %16 = tpu.matmul %15, %1, %cst {dimension_numbers = #tpu.dot_dimension_numbers<[1], [0], [0], [1], [0, 0, 1, 1], [], []>} : vector<2x32xbf16>, vector<32x64xbf16>, vector<2x64xf32> -> vector<2x64xf32>
    %17 = vector.extract_strided_slice %16 {offsets = [0, 0], sizes = [2, 32], strides = [1, 1]} : vector<2x64xf32> to vector<2x32xf32>
    %18 = vector.extract_strided_slice %6 {offsets = [0, 0], sizes = [1, 32], strides = [1, 1]} : vector<10x32xf32> to vector<1x32xf32>
    %19 = vector.broadcast %18 : vector<1x32xf32> to vector<2x32xf32>
    %20 = arith.addf %17, %19 : vector<2x32xf32>
    %cst_13 = arith.constant dense<0.000000e+00> : vector<2xf32>
    %21 = vector.multi_reduction <add>, %20, %cst_13 [1] : vector<2x32xf32> to vector<2xf32>
    %22 = vector.shape_cast %21 : vector<2xf32> to vector<2x1xf32>
    %cst_14 = arith.constant 3.200000e+01 : f32
    %23 = vector.broadcast %cst_14 : f32 to vector<2x1xf32>
    %24 = arith.divf %22, %23 : vector<2x1xf32>
    %25 = vector.broadcast %24 : vector<2x1xf32> to vector<2x32xf32>
    %26 = arith.subf %20, %25 : vector<2x32xf32>
    %27 = arith.mulf %26, %26 : vector<2x32xf32>
    %cst_15 = arith.constant dense<0.000000e+00> : vector<2xf32>
    %28 = vector.multi_reduction <add>, %27, %cst_15 [1] : vector<2x32xf32> to vector<2xf32>
    %29 = vector.shape_cast %28 : vector<2xf32> to vector<2x1xf32>
    %cst_16 = arith.constant 3.200000e+01 : f32
    %30 = vector.broadcast %cst_16 : f32 to vector<2x1xf32>
    %31 = arith.divf %29, %30 : vector<2x1xf32>
    %32 = vector.broadcast %24 : vector<2x1xf32> to vector<2x32xf32>
    %33 = arith.subf %20, %32 : vector<2x32xf32>
    %cst_17 = arith.constant 9.99999974E-6 : f32
    %34 = vector.broadcast %cst_17 : f32 to vector<2x1xf32>
    %35 = arith.addf %31, %34 : vector<2x1xf32>
    %36 = math.rsqrt %35 : vector<2x1xf32>
    %37 = vector.broadcast %36 : vector<2x1xf32> to vector<2x32xf32>
    %38 = arith.mulf %33, %37 : vector<2x32xf32>
    %39 = vector.broadcast %7 : vector<1x32xf32> to vector<2x32xf32>
    %40 = arith.mulf %38, %39 : vector<2x32xf32>
    %41 = vector.broadcast %8 : vector<1x32xf32> to vector<2x32xf32>
    %42 = arith.addf %40, %41 : vector<2x32xf32>
    %43 = arith.addf %0, %42 : vector<2x32xf32>
    %cst_18 = arith.constant dense<0.000000e+00> : vector<2xf32>
    %44 = vector.multi_reduction <add>, %43, %cst_18 [1] : vector<2x32xf32> to vector<2xf32>
    %45 = vector.shape_cast %44 : vector<2xf32> to vector<2x1xf32>
    %cst_19 = arith.constant 3.200000e+01 : f32
    %46 = vector.broadcast %cst_19 : f32 to vector<2x1xf32>
    %47 = arith.divf %45, %46 : vector<2x1xf32>
    %48 = vector.broadcast %47 : vector<2x1xf32> to vector<2x32xf32>
    %49 = arith.subf %43, %48 : vector<2x32xf32>
    %50 = arith.mulf %49, %49 : vector<2x32xf32>
    %cst_20 = arith.constant dense<0.000000e+00> : vector<2xf32>
    %51 = vector.multi_reduction <add>, %50, %cst_20 [1] : vector<2x32xf32> to vector<2xf32>
    %52 = vector.shape_cast %51 : vector<2xf32> to vector<2x1xf32>
    %cst_21 = arith.constant 3.200000e+01 : f32
    %53 = vector.broadcast %cst_21 : f32 to vector<2x1xf32>
    %54 = arith.divf %52, %53 : vector<2x1xf32>
    %55 = vector.broadcast %47 : vector<2x1xf32> to vector<2x32xf32>
    %56 = arith.subf %43, %55 : vector<2x32xf32>
    %cst_22 = arith.constant 9.99999974E-6 : f32
    %57 = vector.broadcast %cst_22 : f32 to vector<2x1xf32>
    %58 = arith.addf %54, %57 : vector<2x1xf32>
    %59 = math.rsqrt %58 : vector<2x1xf32>
    %60 = vector.broadcast %59 : vector<2x1xf32> to vector<2x32xf32>
    %61 = arith.mulf %56, %60 : vector<2x32xf32>
    %62 = vector.broadcast %9 : vector<1x32xf32> to vector<2x32xf32>
    %63 = arith.mulf %61, %62 : vector<2x32xf32>
    %64 = vector.broadcast %10 : vector<1x32xf32> to vector<2x32xf32>
    %65 = arith.addf %63, %64 : vector<2x32xf32>
    %66 = arith.truncf %65 : vector<2x32xf32> to vector<2x32xbf16>
    %cst_23 = arith.constant dense<0.000000e+00> : vector<2x64xf32>
    %67 = tpu.matmul %66, %2, %cst_23 {dimension_numbers = #tpu.dot_dimension_numbers<[1], [0], [0], [1], [0, 0, 1, 1], [], []>} : vector<2x32xbf16>, vector<32x64xbf16>, vector<2x64xf32> -> vector<2x64xf32>
    %68 = vector.broadcast %5 : vector<1x64xf32> to vector<2x64xf32>
    %69 = arith.addf %67, %68 : vector<2x64xf32>
    %cst_24 = arith.constant 5.000000e-01 : f32
    %70 = vector.broadcast %cst_24 : f32 to vector<2x64xf32>
    %71 = arith.mulf %70, %69 : vector<2x64xf32>
    %cst_25 = arith.constant 4.471500e-02 : f32
    %72 = vector.broadcast %cst_25 : f32 to vector<2x64xf32>
    %73 = arith.mulf %72, %69 : vector<2x64xf32>
    %74 = arith.mulf %73, %69 : vector<2x64xf32>
    %75 = arith.mulf %74, %69 : vector<2x64xf32>
    %76 = arith.addf %69, %75 : vector<2x64xf32>
    %cst_26 = arith.constant 0.797884583 : f32
    %77 = vector.broadcast %cst_26 : f32 to vector<2x64xf32>
    %78 = arith.mulf %77, %76 : vector<2x64xf32>
    %79 = math.tanh %78 : vector<2x64xf32>
    %cst_27 = arith.constant 1.000000e+00 : f32
    %80 = vector.broadcast %cst_27 : f32 to vector<2x64xf32>
    %81 = arith.addf %80, %79 : vector<2x64xf32>
    %82 = arith.mulf %71, %81 : vector<2x64xf32>
    %83 = arith.truncf %82 : vector<2x64xf32> to vector<2x64xbf16>
    %cst_28 = arith.constant dense<0.000000e+00> : vector<2x32xf32>
    %84 = tpu.matmul %83, %3, %cst_28 {dimension_numbers = #tpu.dot_dimension_numbers<[1], [0], [0], [1], [0, 0, 1, 1], [], []>} : vector<2x64xbf16>, vector<64x32xbf16>, vector<2x32xf32> -> vector<2x32xf32>
    %85 = vector.broadcast %13 : vector<1x32xf32> to vector<2x32xf32>
    %86 = arith.addf %84, %85 : vector<2x32xf32>
    %cst_29 = arith.constant 5.000000e-01 : f32
    %87 = vector.broadcast %cst_29 : f32 to vector<2x32xf32>
    %88 = arith.mulf %87, %86 : vector<2x32xf32>
    %cst_30 = arith.constant 4.471500e-02 : f32
    %89 = vector.broadcast %cst_30 : f32 to vector<2x32xf32>
    %90 = arith.mulf %89, %86 : vector<2x32xf32>
    %91 = arith.mulf %90, %86 : vector<2x32xf32>
    %92 = arith.mulf %91, %86 : vector<2x32xf32>
    %93 = arith.addf %86, %92 : vector<2x32xf32>
    %cst_31 = arith.constant 0.797884583 : f32
    %94 = vector.broadcast %cst_31 : f32 to vector<2x32xf32>
    %95 = arith.mulf %94, %93 : vector<2x32xf32>
    %96 = math.tanh %95 : vector<2x32xf32>
    %cst_32 = arith.constant 1.000000e+00 : f32
    %97 = vector.broadcast %cst_32 : f32 to vector<2x32xf32>
    %98 = arith.addf %97, %96 : vector<2x32xf32>
    %99 = arith.mulf %88, %98 : vector<2x32xf32>
    %100 = arith.truncf %99 : vector<2x32xf32> to vector<2x32xbf16>
    %cst_33 = arith.constant dense<0.000000e+00> : vector<2x32xf32>
    %101 = tpu.matmul %100, %4, %cst_33 {dimension_numbers = #tpu.dot_dimension_numbers<[1], [0], [0], [1], [0, 0, 1, 1], [], []>} : vector<2x32xbf16>, vector<32x32xbf16>, vector<2x32xf32> -> vector<2x32xf32>
    %102 = vector.broadcast %14 : vector<1x32xf32> to vector<2x32xf32>
    %103 = arith.addf %101, %102 : vector<2x32xf32>
    %104 = arith.addf %65, %103 : vector<2x32xf32>
    %cst_34 = arith.constant dense<0.000000e+00> : vector<2xf32>
    %105 = vector.multi_reduction <add>, %104, %cst_34 [1] : vector<2x32xf32> to vector<2xf32>
    %106 = vector.shape_cast %105 : vector<2xf32> to vector<2x1xf32>
    %cst_35 = arith.constant 3.200000e+01 : f32
    %107 = vector.broadcast %cst_35 : f32 to vector<2x1xf32>
    %108 = arith.divf %106, %107 : vector<2x1xf32>
    %109 = vector.broadcast %108 : vector<2x1xf32> to vector<2x32xf32>
    %110 = arith.subf %104, %109 : vector<2x32xf32>
    %111 = arith.mulf %110, %110 : vector<2x32xf32>
    %cst_36 = arith.constant dense<0.000000e+00> : vector<2xf32>
    %112 = vector.multi_reduction <add>, %111, %cst_36 [1] : vector<2x32xf32> to vector<2xf32>
    %113 = vector.shape_cast %112 : vector<2xf32> to vector<2x1xf32>
    %cst_37 = arith.constant 3.200000e+01 : f32
    %114 = vector.broadcast %cst_37 : f32 to vector<2x1xf32>
    %115 = arith.divf %113, %114 : vector<2x1xf32>
    %116 = vector.broadcast %108 : vector<2x1xf32> to vector<2x32xf32>
    %117 = arith.subf %104, %116 : vector<2x32xf32>
    %cst_38 = arith.constant 9.99999974E-6 : f32
    %118 = vector.broadcast %cst_38 : f32 to vector<2x1xf32>
    %119 = arith.addf %115, %118 : vector<2x1xf32>
    %120 = math.rsqrt %119 : vector<2x1xf32>
    %121 = vector.broadcast %120 : vector<2x1xf32> to vector<2x32xf32>
    %122 = arith.mulf %117, %121 : vector<2x32xf32>
    %123 = vector.broadcast %11 : vector<1x32xf32> to vector<2x32xf32>
    %124 = arith.mulf %122, %123 : vector<2x32xf32>
    %125 = vector.broadcast %12 : vector<1x32xf32> to vector<2x32xf32>
    %126 = arith.addf %124, %125 : vector<2x32xf32>
    %127 = vector.extract_strided_slice %16 {offsets = [0, 32], sizes = [2, 32], strides = [1, 1]} : vector<2x64xf32> to vector<2x32xf32>
    %128 = vector.extract_strided_slice %6 {offsets = [1, 0], sizes = [1, 32], strides = [1, 1]} : vector<10x32xf32> to vector<1x32xf32>
    %129 = vector.broadcast %128 : vector<1x32xf32> to vector<2x32xf32>
    %130 = arith.addf %127, %129 : vector<2x32xf32>
    %cst_39 = arith.constant dense<0.000000e+00> : vector<2xf32>
    %131 = vector.multi_reduction <add>, %130, %cst_39 [1] : vector<2x32xf32> to vector<2xf32>
    %132 = vector.shape_cast %131 : vector<2xf32> to vector<2x1xf32>
    %cst_40 = arith.constant 3.200000e+01 : f32
    %133 = vector.broadcast %cst_40 : f32 to vector<2x1xf32>
    %134 = arith.divf %132, %133 : vector<2x1xf32>
    %135 = vector.broadcast %134 : vector<2x1xf32> to vector<2x32xf32>
    %136 = arith.subf %130, %135 : vector<2x32xf32>
    %137 = arith.mulf %136, %136 : vector<2x32xf32>
    %cst_41 = arith.constant dense<0.000000e+00> : vector<2xf32>
    %138 = vector.multi_reduction <add>, %137, %cst_41 [1] : vector<2x32xf32> to vector<2xf32>
    %139 = vector.shape_cast %138 : vector<2xf32> to vector<2x1xf32>
    %cst_42 = arith.constant 3.200000e+01 : f32
    %140 = vector.broadcast %cst_42 : f32 to vector<2x1xf32>
    %141 = arith.divf %139, %140 : vector<2x1xf32>
    %142 = vector.broadcast %134 : vector<2x1xf32> to vector<2x32xf32>
    %143 = arith.subf %130, %142 : vector<2x32xf32>
    %cst_43 = arith.constant 9.99999974E-6 : f32
    %144 = vector.broadcast %cst_43 : f32 to vector<2x1xf32>
    %145 = arith.addf %141, %144 : vector<2x1xf32>
    %146 = math.rsqrt %145 : vector<2x1xf32>
    %147 = vector.broadcast %146 : vector<2x1xf32> to vector<2x32xf32>
    %148 = arith.mulf %143, %147 : vector<2x32xf32>
    %149 = vector.broadcast %7 : vector<1x32xf32> to vector<2x32xf32>
    %150 = arith.mulf %148, %149 : vector<2x32xf32>
    %151 = vector.broadcast %8 : vector<1x32xf32> to vector<2x32xf32>
    %152 = arith.addf %150, %151 : vector<2x32xf32>
    %153 = arith.addf %0, %152 : vector<2x32xf32>
    %cst_44 = arith.constant dense<0.000000e+00> : vector<2xf32>
    %154 = vector.multi_reduction <add>, %153, %cst_44 [1] : vector<2x32xf32> to vector<2xf32>
    %155 = vector.shape_cast %154 : vector<2xf32> to vector<2x1xf32>
    %cst_45 = arith.constant 3.200000e+01 : f32
    %156 = vector.broadcast %cst_45 : f32 to vector<2x1xf32>
    %157 = arith.divf %155, %156 : vector<2x1xf32>
    %158 = vector.broadcast %157 : vector<2x1xf32> to vector<2x32xf32>
    %159 = arith.subf %153, %158 : vector<2x32xf32>
    %160 = arith.mulf %159, %159 : vector<2x32xf32>
    %cst_46 = arith.constant dense<0.000000e+00> : vector<2xf32>
    %161 = vector.multi_reduction <add>, %160, %cst_46 [1] : vector<2x32xf32> to vector<2xf32>
    %162 = vector.shape_cast %161 : vector<2xf32> to vector<2x1xf32>
    %cst_47 = arith.constant 3.200000e+01 : f32
    %163 = vector.broadcast %cst_47 : f32 to vector<2x1xf32>
    %164 = arith.divf %162, %163 : vector<2x1xf32>
    %165 = vector.broadcast %157 : vector<2x1xf32> to vector<2x32xf32>
    %166 = arith.subf %153, %165 : vector<2x32xf32>
    %cst_48 = arith.constant 9.99999974E-6 : f32
    %167 = vector.broadcast %cst_48 : f32 to vector<2x1xf32>
    %168 = arith.addf %164, %167 : vector<2x1xf32>
    %169 = math.rsqrt %168 : vector<2x1xf32>
    %170 = vector.broadcast %169 : vector<2x1xf32> to vector<2x32xf32>
    %171 = arith.mulf %166, %170 : vector<2x32xf32>
    %172 = vector.broadcast %9 : vector<1x32xf32> to vector<2x32xf32>
    %173 = arith.mulf %171, %172 : vector<2x32xf32>
    %174 = vector.broadcast %10 : vector<1x32xf32> to vector<2x32xf32>
    %175 = arith.addf %173, %174 : vector<2x32xf32>
    %176 = arith.truncf %175 : vector<2x32xf32> to vector<2x32xbf16>
    %cst_49 = arith.constant dense<0.000000e+00> : vector<2x64xf32>
    %177 = tpu.matmul %176, %2, %cst_49 {dimension_numbers = #tpu.dot_dimension_numbers<[1], [0], [0], [1], [0, 0, 1, 1], [], []>} : vector<2x32xbf16>, vector<32x64xbf16>, vector<2x64xf32> -> vector<2x64xf32>
    %178 = vector.broadcast %5 : vector<1x64xf32> to vector<2x64xf32>
    %179 = arith.addf %177, %178 : vector<2x64xf32>
    %cst_50 = arith.constant 5.000000e-01 : f32
    %180 = vector.broadcast %cst_50 : f32 to vector<2x64xf32>
    %181 = arith.mulf %180, %179 : vector<2x64xf32>
    %cst_51 = arith.constant 4.471500e-02 : f32
    %182 = vector.broadcast %cst_51 : f32 to vector<2x64xf32>
    %183 = arith.mulf %182, %179 : vector<2x64xf32>
    %184 = arith.mulf %183, %179 : vector<2x64xf32>
    %185 = arith.mulf %184, %179 : vector<2x64xf32>
    %186 = arith.addf %179, %185 : vector<2x64xf32>
    %cst_52 = arith.constant 0.797884583 : f32
    %187 = vector.broadcast %cst_52 : f32 to vector<2x64xf32>
    %188 = arith.mulf %187, %186 : vector<2x64xf32>
    %189 = math.tanh %188 : vector<2x64xf32>
    %cst_53 = arith.constant 1.000000e+00 : f32
    %190 = vector.broadcast %cst_53 : f32 to vector<2x64xf32>
    %191 = arith.addf %190, %189 : vector<2x64xf32>
    %192 = arith.mulf %181, %191 : vector<2x64xf32>
    %193 = arith.truncf %192 : vector<2x64xf32> to vector<2x64xbf16>
    %cst_54 = arith.constant dense<0.000000e+00> : vector<2x32xf32>
    %194 = tpu.matmul %193, %3, %cst_54 {dimension_numbers = #tpu.dot_dimension_numbers<[1], [0], [0], [1], [0, 0, 1, 1], [], []>} : vector<2x64xbf16>, vector<64x32xbf16>, vector<2x32xf32> -> vector<2x32xf32>
    %195 = vector.broadcast %13 : vector<1x32xf32> to vector<2x32xf32>
    %196 = arith.addf %194, %195 : vector<2x32xf32>
    %cst_55 = arith.constant 5.000000e-01 : f32
    %197 = vector.broadcast %cst_55 : f32 to vector<2x32xf32>
    %198 = arith.mulf %197, %196 : vector<2x32xf32>
    %cst_56 = arith.constant 4.471500e-02 : f32
    %199 = vector.broadcast %cst_56 : f32 to vector<2x32xf32>
    %200 = arith.mulf %199, %196 : vector<2x32xf32>
    %201 = arith.mulf %200, %196 : vector<2x32xf32>
    %202 = arith.mulf %201, %196 : vector<2x32xf32>
    %203 = arith.addf %196, %202 : vector<2x32xf32>
    %cst_57 = arith.constant 0.797884583 : f32
    %204 = vector.broadcast %cst_57 : f32 to vector<2x32xf32>
    %205 = arith.mulf %204, %203 : vector<2x32xf32>
    %206 = math.tanh %205 : vector<2x32xf32>
    %cst_58 = arith.constant 1.000000e+00 : f32
    %207 = vector.broadcast %cst_58 : f32 to vector<2x32xf32>
    %208 = arith.addf %207, %206 : vector<2x32xf32>
    %209 = arith.mulf %198, %208 : vector<2x32xf32>
    %210 = arith.truncf %209 : vector<2x32xf32> to vector<2x32xbf16>
    %cst_59 = arith.constant dense<0.000000e+00> : vector<2x32xf32>
    %211 = tpu.matmul %210, %4, %cst_59 {dimension_numbers = #tpu.dot_dimension_numbers<[1], [0], [0], [1], [0, 0, 1, 1], [], []>} : vector<2x32xbf16>, vector<32x32xbf16>, vector<2x32xf32> -> vector<2x32xf32>
    %212 = vector.broadcast %14 : vector<1x32xf32> to vector<2x32xf32>
    %213 = arith.addf %211, %212 : vector<2x32xf32>
    %214 = arith.addf %175, %213 : vector<2x32xf32>
    %cst_60 = arith.constant dense<0.000000e+00> : vector<2xf32>
    %215 = vector.multi_reduction <add>, %214, %cst_60 [1] : vector<2x32xf32> to vector<2xf32>
    %216 = vector.shape_cast %215 : vector<2xf32> to vector<2x1xf32>
    %cst_61 = arith.constant 3.200000e+01 : f32
    %217 = vector.broadcast %cst_61 : f32 to vector<2x1xf32>
    %218 = arith.divf %216, %217 : vector<2x1xf32>
    %219 = vector.broadcast %218 : vector<2x1xf32> to vector<2x32xf32>
    %220 = arith.subf %214, %219 : vector<2x32xf32>
    %221 = arith.mulf %220, %220 : vector<2x32xf32>
    %cst_62 = arith.constant dense<0.000000e+00> : vector<2xf32>
    %222 = vector.multi_reduction <add>, %221, %cst_62 [1] : vector<2x32xf32> to vector<2xf32>
    %223 = vector.shape_cast %222 : vector<2xf32> to vector<2x1xf32>
    %cst_63 = arith.constant 3.200000e+01 : f32
    %224 = vector.broadcast %cst_63 : f32 to vector<2x1xf32>
    %225 = arith.divf %223, %224 : vector<2x1xf32>
    %226 = vector.broadcast %218 : vector<2x1xf32> to vector<2x32xf32>
    %227 = arith.subf %214, %226 : vector<2x32xf32>
    %cst_64 = arith.constant 9.99999974E-6 : f32
    %228 = vector.broadcast %cst_64 : f32 to vector<2x1xf32>
    %229 = arith.addf %225, %228 : vector<2x1xf32>
    %230 = math.rsqrt %229 : vector<2x1xf32>
    %231 = vector.broadcast %230 : vector<2x1xf32> to vector<2x32xf32>
    %232 = arith.mulf %227, %231 : vector<2x32xf32>
    %233 = vector.broadcast %11 : vector<1x32xf32> to vector<2x32xf32>
    %234 = arith.mulf %232, %233 : vector<2x32xf32>
    %235 = vector.broadcast %12 : vector<1x32xf32> to vector<2x32xf32>
    %236 = arith.addf %234, %235 : vector<2x32xf32>
    %237 = tpu.concatenate %126, %236 in 1 : vector<2x32xf32>, vector<2x32xf32> -> vector<2x64xf32>
    %c0_65 = arith.constant 0 : index
    %c0_66 = arith.constant 0 : index
    %238 = vector.load %arg8[%c0_65, %c0_66] : memref<2x64xf32, #tpu.memory_space<vmem>>, vector<2x64xf32>
    tpu.vector_store %arg8[%c0_65, %c0_66], %237 {strides = array<i32>} : memref<2x64xf32, #tpu.memory_space<vmem>>, vector<2x64xf32>,
    return
  }
  func.func @transform_0(%arg0: i32) -> (i32, i32) {
    %c0_i32 = arith.constant 0 : i32
    %c0_i32_0 = arith.constant 0 : i32
    return %arg0, %c0_i32 : i32, i32
  }
  func.func @transform_1(%arg0: i32) -> (i32, i32) {
    %c0_i32 = arith.constant 0 : i32
    %c0_i32_0 = arith.constant 0 : i32
    %c0_i32_1 = arith.constant 0 : i32
    return %c0_i32, %c0_i32_0 : i32, i32
  }
  func.func @transform_2(%arg0: i32) -> (i32, i32) {
    %c0_i32 = arith.constant 0 : i32
    %c0_i32_0 = arith.constant 0 : i32
    %c0_i32_1 = arith.constant 0 : i32
    return %c0_i32, %c0_i32_0 : i32, i32
  }
  func.func @transform_3(%arg0: i32) -> (i32, i32) {
    %c0_i32 = arith.constant 0 : i32
    %c0_i32_0 = arith.constant 0 : i32
    %c0_i32_1 = arith.constant 0 : i32
    return %c0_i32, %c0_i32_0 : i32, i32
  }
  func.func @transform_4(%arg0: i32) -> (i32, i32) {
    %c0_i32 = arith.constant 0 : i32
    %c0_i32_0 = arith.constant 0 : i32
    %c0_i32_1 = arith.constant 0 : i32
    return %c0_i32, %c0_i32_0 : i32, i32
  }
  func.func @transform_5(%arg0: i32) -> (i32, i32) {
    %c0_i32 = arith.constant 0 : i32
    %c0_i32_0 = arith.constant 0 : i32
    %c0_i32_1 = arith.constant 0 : i32
    return %c0_i32, %c0_i32_0 : i32, i32
  }
  func.func @transform_6(%arg0: i32) -> (i32, i32) {
    %c0_i32 = arith.constant 0 : i32
    %c0_i32_0 = arith.constant 0 : i32
    %c0_i32_1 = arith.constant 0 : i32
    return %c0_i32, %c0_i32_0 : i32, i32
  }
  func.func @transform_7(%arg0: i32) -> (i32, i32) {
    %c0_i32 = arith.constant 0 : i32
    %c0_i32_0 = arith.constant 0 : i32
    return %arg0, %c0_i32 : i32, i32
  }
}

</mosaic_0001>

<bundles_post_ra>
// kernel: enhanced_transformer_block.1
= control target key start
LH: loop header
LB: loop body
LE: loop exit
PB: predicated region body
PF: predicated region fallthrough
CT: control target
= control target key end

     0   :  { %12 = vsyncpa [#allocation3], 0  ;;  %s819_s24 = smov [#allocation2]   ;;  %s1060_s0 = inlined_call_operand.vmem [shape: f32[2,32], index: 0, kind: input, shape index: {}]   ;;  %s1061_s1 = inlined_call_operand.vmem [shape: bf16[32,64], index: 1, kind: input, shape index: {}]   ;;  %s1062_s2 = inlined_call_operand.vmem [shape: bf16[32,64], index: 2, kind: input, shape index: {}]   ;;  %s1063_s3 = inlined_call_operand.vmem [shape: bf16[64,32], index: 3, kind: input, shape index: {}]   ;;  %s1064_s4 = inlined_call_operand.vmem [shape: bf16[32,32], index: 4, kind: input, shape index: {}]   ;;  %s1065_s5 = inlined_call_operand.vmem [shape: f32[1,64], index: 5, kind: input, shape index: {}]   ;;  %s1066_s6 = inlined_call_operand.hbm [shape: f32[10,32], index: 6, kind: input, shape index: {}]   ;;  %s1067_s7 = inlined_call_operand.vmem [shape: f32[2,64], index: 7, kind: output, shape index: {}]  }
   0x1   :  { %s30_s25 = sshll.u32 %s819_s24, 4  ;;  %s795_s28 = scalar_lea.hbm %s1066_s6, 256  ;;  %s31_s25 = int_to_ptr.vmem [resolvable:$true] %s30_s25 }
   0x2   :  { %p796_p0 = scmp.ne.s32.totalorder %s1066_s6, %s795_s28  ;;  %p799_p1 = scmp.lt.u32.totalorder %s795_s28, %s1066_s6 }
   0x4   :  { %p801_p2 = pnand %p799_p1, %p796_p0 }
   0x6   :  { %804 = shalt.err (!%p801_p2)
}
   0x7   :  { %s805_s10 = scalar_lea.vmem %s31_s25, 256  ;;  %p810_p4 = scmp.lt.s32.totalorder %s31_s25, %s31_s25 }
   0x8   :  { %p806_p3 = scmp.ne.s32.totalorder %s31_s25, %s805_s10  ;;  %p811_p5 = scmp.lt.s32.totalorder %s805_s10, %s805_s10 }
   0xa   :  { %p812_p6 = por %p811_p5, %p810_p4 }
   0xc   :  { %p813_p7 = pnand %p812_p6, %p806_p3 }
   0xe   :  { %816 = shalt.err (!%p813_p7)
}
   0xf   :  { %s820_s11 = smov 128   ;;  %s821_s12 = smov 8  }
  0x10   :  { %36 = dma.hbm_to_vmem [thread:$0]  %s1066_s6, 256, %s31_s25, [#allocation3], %s820_s11, %s820_s11, %s821_s12  }
  0x11   :  { %817 = dma.done.wait [#allocation3], 256  }
  0x12   :  { %818 = vsyncadd [#allocation3], 4294967040  ;;  %v822_v0 = vmov 0.0   ;;  %vm823_vm0 = vmmov 0   ;;  %v765_v1 = vld [vmem:[%s1061_s1] sm:$0xff]   ;;  %v766_v2 = vld [vmem:[%s1061_s1 + $0x8] sm:$0xff]   ;;  %v122_v5 = vlaneseq }
  0x13   :  { %694 = vmatprep.subr.bf16.mxu0 %v822_v0  ;;  %698 = vmatprep.mubr.msk.bf16.mxu0 %vm823_vm0, %v822_v0  ;;  %vm78_vm1 = vcmask 261120   ;;  %v893_v3 = vld [vmem:[%s1060_s0] sm:$0x3]  ;;  %vm127_vm2 = vcmask 254976   ;;  %s824_s0 = smov 32   ;;  %s825_s1 = smov 96  }
  0x14   :  { %702 = vmatprep.subr.bf16.mxu1 %v822_v0  ;;  %706 = vmatprep.mubr.msk.bf16.mxu1 %vm823_vm0, %v822_v0  ;;  %v65_v4 = vpack.c.bf16 %v893_v3, %v893_v3  ;;  %v902_v6 = vshrl.u32 %v122_v5, 7  ;;  %v905_v8 = vld [vmem:[#allocation2] sm:$0xff]  ;;  %v937_v44 = vld [vmem:[%s1062_s2 + $0x8] sm:$0xff]   ;;  %v771_v61 = vld [vmem:[%s1063_s3 + $0x10] sm:$0xff]   ;;  %vm276_vm3 = vcmask 523264   ;;  %vm644_vm4 = vcmask 517120  }
  0x15   :  { %695 = vmatpush3.bf16.msra.mxu0 %v765_v1  ;;  %v931_v43 = vld [vmem:[%s1062_s2] sm:$0xff]   ;;  %v770_v60 = vld [vmem:[%s1063_s3 + $0x8] sm:$0xff]   ;;  %v772_v62 = vld [vmem:[%s1063_s3 + $0x18] sm:$0xff]  }
  0x16   :  { %696 = vmatprep.subr.bf16.mxu0 %v822_v0  ;;  %v124_v7 = vsub.s32 0, %v902_v6  ;;  %v332_v21 = vsub.s32 1, %v902_v6  ;;  %v144_v26 = vsub.s32 2, %v902_v6  ;;  %v149_v27 = vsub.s32 3, %v902_v6  ;;  %703 = vmatpush3.bf16.msra.mxu1 %v931_v43  ;;  %v769_v59 = vld [vmem:[%s1063_s3] sm:$0xff]  }
  0x17   :  { %704 = vmatprep.subr.bf16.mxu1 %v822_v0  ;;  %v168_v50 = vsub.s32 4, %v902_v6  ;;  %v173_v51 = vsub.s32 5, %v902_v6  ;;  %v981_v5 = vld [vmem:[%s1065_s5] ss:$0 sm:$0xff] }
  0x18   :  { %v125_v9 = vrot.slane %v905_v8, %v124_v7  ;;  %v416_v22 = vrot.slane %v905_v8, %v332_v21  ;;  %v145_v28 = vrot.slane %v905_v8, %v144_v26  ;;  %v921_v31 = vrot.slane %v905_v8, %v149_v27  ;;  %v996_v27 = vld [vmem:[%s1064_s4] sm:$0xff]  }
  0x19   :  { %697 = vmatpush3.bf16.msra.mxu0 %v766_v2  ;;  %v946_v52 = vrot.slane %v905_v8, %v168_v50  ;;  %v949_v55 = vrot.slane %v905_v8, %v173_v51 }
  0x1a   :  { %710 = vmatprep.subr.bf16.mxu0 %v822_v0  ;;  %705 = vmatpush3.bf16.msra.mxu1 %v937_v44 }
  0x1b   :  { %722 = vmatprep.subr.bf16.mxu1 %v822_v0 }
  0x1c   :  { %699 = vmatmul.mubr.msk.bf16.vlgmr.msra.gmra.mrb[0].mxu0 %vm78_vm1, %v65_v4 }
  0x1d   :  { %718 = vmatprep.mubr.msk.bf16.mxu0 %vm823_vm0, %v822_v0  ;;  %711 = vmatpush3.bf16.msra.mxu0 %v769_v59 }
  0x1e   :  { %712 = vmatprep.subr.bf16.mxu0 %v822_v0 }
  0x21   :  { %713 = vmatpush3.bf16.msra.mxu0 %v770_v60 }
  0x22   :  { %714 = vmatprep.subr.bf16.mxu0 %v822_v0 }
  0x25   :  { %715 = vmatpush3.bf16.msra.mxu0 %v771_v61 }
  0x26   :  { %716 = vmatprep.subr.bf16.mxu0 %v822_v0 }
  0x29   :  { %717 = vmatpush3.bf16.msra.mxu0 %v772_v62 }
  0x2a   :  { %738 = vmatprep.subr.bf16.mxu0 %v822_v0 }
  0xef   :  { %v116_v10 = vpop.f32.mrb[0].mxu0 }
  0xf0   :  { %v700_v11 = vpop.f32.mrb[1].mxu0  ;;  %v126_v12 = vadd.f32 %v125_v9, %v116_v10 }
  0xf1   :  { %v119_v13 = vpop.f32.mrb[2].mxu0 }
  0xf2   :  { %v701_v14 = vpop.f32.mrb[3].mxu0  ;;  %v128_v15 = vsel %vm127_vm2, %v126_v12, 0.0 }
  0xf3   :  { %129 = vadd.xlane.f32.xlu0 %v128_v15 }
 0x180   :  { %v130_v16 = vpop.xlane.xlu0 %129 }
 0x181   :  { %v132_v17 = vmul.f32 0.03125, %v130_v16 }
 0x183   :  { %v133_v18 = vsub.f32 %v126_v12, %v132_v17 }
 0x185   :  { %v134_v19 = vmul.f32 %v133_v18, %v133_v18 }
 0x187   :  { %v135_v20 = vsel %vm127_vm2, %v134_v19, 0.0 }
 0x188   :  { %136 = vadd.xlane.f32.xlu0 %v135_v20 }
 0x19e   :  { %418 = vrot.lane.b32.xlu0 %v416_v22, %s824_s0 }
 0x215   :  { %v137_v23 = vpop.xlane.xlu0 %136 }
 0x216   :  { %v138_v24 = vmul.f32 0.03125, %v137_v23 }
 0x218   :  { %v139_v25 = vadd.f32 1e-05, %v138_v24 }
 0x219   :  { %v419_v41 = vpop.permute.xlu0 %418 }
 0x21a   :  { %775 = vrsqrt.f32 %v139_v25  ;;  %v421_v42 = vadd.f32 %v419_v41, %v116_v10 }
 0x224   :  { %v776_v29 = vpop.eup %775 }
 0x225   :  { %v141_v30 = vmul.f32 %v776_v29, %v133_v18 }
 0x227   :  { %v146_v32 = vmul.f32 %v145_v28, %v141_v30 }
 0x229   :  { %v151_v33 = vadd.f32 %v921_v31, %v146_v32 }
 0x22b   :  { %v152_v34 = vadd.f32 %v151_v33, %v893_v3 }
 0x22d   :  { %v153_v35 = vsel %vm127_vm2, %v152_v34, 0.0 }
 0x22e   :  { %154 = vadd.xlane.f32.xlu1 %v153_v35 }
 0x2bb   :  { %v155_v36 = vpop.xlane.xlu1 %154 }
 0x2bc   :  { %v156_v37 = vmul.f32 0.03125, %v155_v36 }
 0x2be   :  { %v157_v38 = vsub.f32 %v152_v34, %v156_v37 }
 0x2c0   :  { %v158_v39 = vmul.f32 %v157_v38, %v157_v38 }
 0x2c2   :  { %v159_v40 = vsel %vm127_vm2, %v158_v39, 0.0 }
 0x2c3   :  { %160 = vadd.xlane.f32.xlu1 %v159_v40 }
 0x2d4   :  { %423 = vrot.lane.b32.xlu1 %v421_v42, %s825_s1 }
 0x350   :  { %v161_v45 = vpop.xlane.xlu1 %160 }
 0x351   :  { %v162_v46 = vmul.f32 0.03125, %v161_v45 }
 0x353   :  { %v163_v47 = vadd.f32 1e-05, %v162_v46 }
 0x354   :  { %v424_v48 = vpop.permute.xlu1 %423 }
 0x355   :  { %777 = vrsqrt.f32 %v163_v47  ;;  %v426_v49 = vsel %vm127_vm2, %v424_v48, 0.0 }
 0x356   :  { %427 = vadd.xlane.f32.xlu1 %v426_v49 }
 0x35f   :  { %v778_v53 = vpop.eup %777 }
 0x360   :  { %v165_v54 = vmul.f32 %v778_v53, %v157_v38  ;;  %v64_v38 = vld [vmem:[#allocation2 + $0x8] sm:$0x3] }
 0x361   :  { %v1010_v39 = vrot.slane %v64_v38, %v124_v7 }
 0x362   :  { %v170_v56 = vmul.f32 %v946_v52, %v165_v54 }
 0x364   :  { %v953_v57 = vadd.f32 %v949_v55, %v170_v56 }
 0x366   :  { %v176_v58 = vpack.c.bf16 %v953_v57, %v953_v57 }
 0x367   :  { %444 = vrot.lane.b32.xlu1 %v145_v28, %s824_s0  ;;  %v1002_v28 = vld [vmem:[%s1064_s4 + $0x8] sm:$0xff]  }
 0x368   :  { %707 = vmatmul.mubr.msk.bf16.vlgmr.msra.gmra.mrb[0].mxu1 %vm78_vm1, %v176_v58 }
 0x369   :  { %726 = vmatprep.mubr.msk.bf16.mxu1 %vm823_vm0, %v822_v0  ;;  %723 = vmatpush3.bf16.msra.mxu1 %v996_v27 }
 0x36a   :  { %724 = vmatprep.subr.bf16.mxu1 %v822_v0 }
 0x36d   :  { %725 = vmatpush3.bf16.msra.mxu1 %v1002_v28 }
 0x36e   :  { %730 = vmatprep.subr.bf16.mxu1 %v822_v0 }
 0x3e3   :  { %v428_v63 = vpop.xlane.xlu1 %427 }
 0x3e4   :  { %v429_v1 = vmul.f32 0.03125, %v428_v63 }
 0x3e6   :  { %v430_v2 = vsub.f32 %v421_v42, %v429_v1 }
 0x3e7   :  { %v445_v33 = vpop.permute.xlu1 %444 }
 0x3e8   :  { %v431_v4 = vmul.f32 %v430_v2, %v430_v2 }
 0x3ea   :  { %433 = vrot.lane.b32.xlu0 %v431_v4, %s825_s1  ;;  %v1025_v4 = vrot.slane %v64_v38, %v332_v21 }
 0x43b   :  { %v232_v9 = vpop.f32.mrb[0].mxu1 }
 0x43c   :  { %v233_v10 = vadd.f32 %v981_v5, %v232_v9  ;;  %v708_v11 = vpop.f32.mrb[1].mxu1 }
 0x43d   :  { %v235_v12 = vpop.f32.mrb[2].mxu1 }
 0x43e   :  { %v239_v13 = vmul.f32 0.044715, %v233_v10  ;;  %v709_v14 = vpop.f32.mrb[3].mxu1  ;;  %v238_v20 = vmul.f32 0.5, %v233_v10 }
 0x440   :  { %v240_v15 = vmul.f32 %v239_v13, %v233_v10 }
 0x442   :  { %v241_v16 = vmul.f32 %v240_v15, %v233_v10 }
 0x444   :  { %v242_v17 = vadd.f32 %v241_v16, %v233_v10 }
 0x446   :  { %v243_v18 = vmul.f32 0.7978846, %v242_v17 }
 0x448   :  { %779 = vtanh.f32 %v243_v18 }
 0x452   :  { %v780_v19 = vpop.eup %779 }
 0x453   :  { %v245_v22 = vadd.f32 1.0, %v780_v19 }
 0x455   :  { %v246_v23 = vmul.f32 %v245_v22, %v238_v20 }
 0x457   :  { %v247_v24 = vpack.c.bf16 %v246_v23, %v246_v23 }
 0x459   :  { %719 = vmatmul.mubr.msk.bf16.vlgmr.msra.gmra.mrb[4].mxu0 %vm276_vm3, %v247_v24 }
 0x45a   :  { %739 = vmatpush3.bf16.msra.mxu0 %v769_v59  ;;  %746 = vmatprep.mubr.msk.bf16.mxu0 %vm823_vm0, %v822_v0 }
 0x45b   :  { %740 = vmatprep.subr.bf16.mxu0 %v822_v0 }
 0x45c   :  { %v434_v25 = vpop.permute.xlu0 %433 }
 0x45d   :  { %v436_v26 = vsel %vm127_vm2, %v434_v25, 0.0 }
 0x45e   :  { %437 = vadd.xlane.f32.xlu0 %v436_v26  ;;  %741 = vmatpush3.bf16.msra.mxu0 %v770_v60 }
 0x45f   :  { %742 = vmatprep.subr.bf16.mxu0 %v822_v0 }
 0x462   :  { %743 = vmatpush3.bf16.msra.mxu0 %v771_v61 }
 0x463   :  { %744 = vmatprep.subr.bf16.mxu0 %v822_v0 }
 0x466   :  { %745 = vmatpush3.bf16.msra.mxu0 %v772_v62 }
 0x474   :  { %449 = vrot.lane.b32.xlu0 %v921_v31, %s824_s0 }
 0x4eb   :  { %v438_v29 = vpop.xlane.xlu0 %437 }
 0x4ec   :  { %v439_v30 = vmul.f32 0.03125, %v438_v29 }
 0x4ee   :  { %v440_v31 = vadd.f32 1e-05, %v439_v30 }
 0x4ef   :  { %v450_v35 = vpop.permute.xlu0 %449 }
 0x4f0   :  { %781 = vrsqrt.f32 %v440_v31 }
 0x4fa   :  { %v782_v32 = vpop.eup %781 }
 0x4fb   :  { %v442_v34 = vmul.f32 %v782_v32, %v430_v2 }
 0x4fd   :  { %v447_v36 = vmul.f32 %v445_v33, %v442_v34 }
 0x4ff   :  { %v452_v37 = vadd.f32 %v450_v35, %v447_v36 }
 0x501   :  { %454 = vrot.lane.b32.xlu1 %v452_v37, %s825_s1 }
 0x52c   :  { %v314_v40 = vpop.f32.mrb[4].mxu0 }
 0x52d   :  { %v315_v41 = vadd.f32 %v314_v40, %v1010_v39  ;;  %v720_v42 = vpop.f32.mrb[5].mxu0 }
 0x52e   :  { %v317_v45 = vpop.f32.mrb[6].mxu0 }
 0x52f   :  { %v321_v46 = vmul.f32 0.044715, %v315_v41  ;;  %v721_v47 = vpop.f32.mrb[7].mxu0  ;;  %v320_v54 = vmul.f32 0.5, %v315_v41 }
 0x531   :  { %v322_v48 = vmul.f32 %v321_v46, %v315_v41 }
 0x533   :  { %v323_v49 = vmul.f32 %v322_v48, %v315_v41 }
 0x535   :  { %v324_v50 = vadd.f32 %v323_v49, %v315_v41 }
 0x537   :  { %v325_v51 = vmul.f32 0.7978846, %v324_v50 }
 0x539   :  { %783 = vtanh.f32 %v325_v51 }
 0x543   :  { %v784_v53 = vpop.eup %783 }
 0x544   :  { %v327_v56 = vadd.f32 1.0, %v784_v53 }
 0x546   :  { %v328_v58 = vmul.f32 %v327_v56, %v320_v54 }
 0x548   :  { %v329_v59 = vpack.c.bf16 %v328_v58, %v328_v58 }
 0x54a   :  { %727 = vmatmul.mubr.msk.bf16.vlgmr.msra.gmra.mrb[4].mxu1 %vm78_vm1, %v329_v59 }
 0x54b   :  { %731 = vmatpush3.bf16.msra.mxu1 %v931_v43  ;;  %734 = vmatprep.mubr.msk.bf16.mxu1 %vm823_vm0, %v822_v0 }
 0x54c   :  { %732 = vmatprep.subr.bf16.mxu1 %v822_v0 }
 0x54f   :  { %733 = vmatpush3.bf16.msra.mxu1 %v937_v44 }
 0x550   :  { %750 = vmatprep.subr.bf16.mxu1 %v822_v0 }
 0x573   :  { %v455_v7 = vpop.permute.xlu1 %454 }
 0x574   :  { %v457_v60 = vadd.f32 %v455_v7, %v893_v3 }
 0x576   :  { %v458_v61 = vsel %vm127_vm2, %v457_v60, 0.0 }
 0x577   :  { %459 = vadd.xlane.f32.xlu1 %v458_v61 }
 0x604   :  { %v460_v62 = vpop.xlane.xlu1 %459 }
 0x605   :  { %v461_v63 = vmul.f32 0.03125, %v460_v62 }
 0x607   :  { %v462_v1 = vsub.f32 %v457_v60, %v461_v63 }
 0x609   :  { %v463_v2 = vmul.f32 %v462_v1, %v462_v1 }
 0x60b   :  { %v464_v43 = vsel %vm127_vm2, %v463_v2, 0.0 }
 0x60c   :  { %465 = vadd.xlane.f32.xlu0 %v464_v43 }
 0x61d   :  { %v383_v44 = vpop.f32.mrb[4].mxu1 }
 0x61e   :  { %v384_v9 = vadd.f32 %v383_v44, %v1025_v4  ;;  %v728_v10 = vpop.f32.mrb[5].mxu1 }
 0x61f   :  { %v386_v11 = vpop.f32.mrb[6].mxu1 }
 0x620   :  { %v729_v3 = vpop.f32.mrb[7].mxu1  ;;  %v389_v12 = vadd.f32 %v384_v9, %v953_v57 }
 0x621   :  { %v410_v3 = vsub.s32 7, %v902_v6 }
 0x622   :  { %v390_v13 = vsel %vm127_vm2, %v389_v12, 0.0 }
 0x623   :  { %391 = vadd.xlane.f32.xlu1 %v390_v13 }
 0x699   :  { %v466_v14 = vpop.xlane.xlu0 %465 }
 0x69a   :  { %v467_v15 = vmul.f32 0.03125, %v466_v14 }
 0x69c   :  { %v468_v16 = vadd.f32 1e-05, %v467_v15  ;;  %v411_v15 = vrot.slane %v905_v8, %v410_v3 }
 0x69e   :  { %785 = vrsqrt.f32 %v468_v16 }
 0x6a8   :  { %v786_v17 = vpop.eup %785 }
 0x6a9   :  { %v470_v18 = vmul.f32 %v786_v17, %v462_v1 }
 0x6ab   :  { %v471_v21 = vmul.f32 %v470_v18, %v946_v52 }
 0x6ad   :  { %v472_v19 = vadd.f32 %v471_v21, %v949_v55 }
 0x6af   :  { %v473_v20 = vpack.c.bf16 %v472_v19, %v472_v19 }
 0x6b0   :  { %v392_v22 = vpop.xlane.xlu1 %391 }
 0x6b1   :  { %v393_v23 = vmul.f32 0.03125, %v392_v22  ;;  %735 = vmatmul.mubr.msk.bf16.vlgmr.msra.gmra.mrb[8].mxu1 %vm78_vm1, %v473_v20 }
 0x6b2   :  { %751 = vmatpush3.bf16.msra.mxu1 %v996_v27  ;;  %754 = vmatprep.mubr.msk.bf16.mxu1 %vm823_vm0, %v822_v0 }
 0x6b3   :  { %v1036_v57 = vsub.f32 %v389_v12, %v393_v23  ;;  %752 = vmatprep.subr.bf16.mxu1 %v822_v0 }
 0x6b5   :  { %v395_v24 = vmul.f32 %v1036_v57, %v1036_v57 }
 0x6b6   :  { %753 = vmatpush3.bf16.msra.mxu1 %v1002_v28 }
 0x6b7   :  { %v396_v52 = vsel %vm127_vm2, %v395_v24, 0.0 }
 0x6b8   :  { %397 = vadd.xlane.f32.xlu1 %v396_v52 }
 0x745   :  { %v398_v18 = vpop.xlane.xlu1 %397 }
 0x746   :  { %v399_v21 = vmul.f32 0.03125, %v398_v18 }
 0x784   :  { %v511_v55 = vpop.f32.mrb[8].mxu1 }
 0x785   :  { %v512_v25 = vadd.f32 %v981_v5, %v511_v55  ;;  %v736_v26 = vpop.f32.mrb[9].mxu1 }
 0x786   :  { %v514_v27 = vpop.f32.mrb[10].mxu1 }
 0x787   :  { %v518_v29 = vmul.f32 0.044715, %v512_v25  ;;  %v737_v30 = vpop.f32.mrb[11].mxu1  ;;  %v517_v35 = vmul.f32 0.5, %v512_v25 }
 0x789   :  { %v519_v31 = vmul.f32 %v518_v29, %v512_v25 }
 0x78b   :  { %v520_v32 = vmul.f32 %v519_v31, %v512_v25 }
 0x78d   :  { %v521_v33 = vadd.f32 %v520_v32, %v512_v25 }
 0x78f   :  { %v522_v34 = vmul.f32 0.7978846, %v521_v33 }
 0x791   :  { %787 = vtanh.f32 %v522_v34 }
 0x79b   :  { %v788_v0 = vpop.eup %787 }
 0x79c   :  { %v524_v36 = vadd.f32 1.0, %v788_v0 }
 0x79e   :  { %v525_v37 = vmul.f32 %v524_v36, %v517_v35 }
 0x7a0   :  { %v526_v28 = vpack.c.bf16 %v525_v37, %v525_v37 }
 0x7a2   :  { %747 = vmatmul.mubr.msk.bf16.vlgmr.msra.gmra.mrb[8].mxu0 %vm276_vm3, %v526_v28 }
 0x875   :  { %v564_v38 = vpop.f32.mrb[8].mxu0 }
 0x876   :  { %v565_v40 = vadd.f32 %v564_v38, %v1010_v39  ;;  %v748_v5 = vpop.f32.mrb[9].mxu0 }
 0x877   :  { %v567_v41 = vpop.f32.mrb[10].mxu0 }
 0x878   :  { %v571_v42 = vmul.f32 0.044715, %v565_v40  ;;  %v749_v45 = vpop.f32.mrb[11].mxu0  ;;  %v570_v51 = vmul.f32 0.5, %v565_v40 }
 0x87a   :  { %v572_v46 = vmul.f32 %v571_v42, %v565_v40 }
 0x87c   :  { %v573_v47 = vmul.f32 %v572_v46, %v565_v40 }
 0x87e   :  { %v574_v48 = vadd.f32 %v573_v47, %v565_v40 }
 0x880   :  { %v575_v49 = vmul.f32 0.7978846, %v574_v48 }
 0x882   :  { %789 = vtanh.f32 %v575_v49 }
 0x88c   :  { %v790_v50 = vpop.eup %789 }
 0x88d   :  { %v577_v53 = vadd.f32 1.0, %v790_v50 }
 0x88f   :  { %v578_v54 = vmul.f32 %v577_v53, %v570_v51 }
 0x891   :  { %v579_v56 = vpack.c.bf16 %v578_v54, %v578_v54 }
 0x893   :  { %755 = vmatmul.mubr.msk.bf16.vlgmr.msra.gmra.mrb[12].mxu1 %vm78_vm1, %v579_v56 }
 0x966   :  { %v617_v58 = vpop.f32.mrb[12].mxu1 }
 0x967   :  { %v618_v59 = vadd.f32 %v617_v58, %v1025_v4  ;;  %v756_v39 = vpop.f32.mrb[13].mxu1  ;;  %v405_v4 = vsub.s32 6, %v902_v6 }
 0x968   :  { %v620_v7 = vpop.f32.mrb[14].mxu1 }
 0x969   :  { %v757_v60 = vpop.f32.mrb[15].mxu1  ;;  %v623_v61 = vadd.f32 %v618_v59, %v472_v19  ;;  %v406_v13 = vrot.slane %v905_v8, %v405_v4  ;;  %v400_v19 = vadd.f32 1e-05, %v399_v21 }
 0x96b   :  { %v624_v62 = vsel %vm127_vm2, %v623_v61, 0.0 }
 0x96c   :  { %625 = vadd.xlane.f32.xlu0 %v624_v62 }
 0x9f9   :  { %v626_v63 = vpop.xlane.xlu0 %625 }
 0x9fa   :  { %v627_v1 = vmul.f32 0.03125, %v626_v63 }
 0x9fc   :  { %v628_v2 = vsub.f32 %v623_v61, %v627_v1 }
 0x9fe   :  { %v629_v43 = vmul.f32 %v628_v2, %v628_v2 }
 0xa00   :  { %v630_v44 = vsel %vm127_vm2, %v629_v43, 0.0 }
 0xa01   :  { %631 = vadd.xlane.f32.xlu0 %v630_v44 }
 0xa8e   :  { %v632_v9 = vpop.xlane.xlu0 %631 }
 0xa8f   :  { %v633_v10 = vmul.f32 0.03125, %v632_v9 }
 0xa91   :  { %v634_v11 = vadd.f32 1e-05, %v633_v10 }
 0xa93   :  { %791 = vrsqrt.f32 %v634_v11 }
 0xa94   :  { %793 = vrsqrt.f32 %v400_v19 }
 0xa9d   :  { %v792_v12 = vpop.eup %791 }
 0xa9e   :  { %v636_v14 = vmul.f32 %v792_v12, %v628_v2  ;;  %v794_v20 = vpop.eup %793 }
 0xa9f   :  { %v402_v22 = vmul.f32 %v794_v20, %v1036_v57 }
 0xaa0   :  { %v637_v16 = vmul.f32 %v636_v14, %v406_v13 }
 0xaa1   :  { %v407_v23 = vmul.f32 %v406_v13, %v402_v22 }
 0xaa2   :  { %v638_v17 = vadd.f32 %v637_v16, %v411_v15 }
 0xaa3   :  { %v412_v24 = vadd.f32 %v411_v15, %v407_v23 }
 0xaa4   :  { %640 = vrot.lane.b32.xlu0 %v638_v17, %s824_s0 }
 0xb16   :  { %v641_v6 = vpop.permute.xlu0 %640 }
 0xb17   :  { %v643_v52 = vsel %vm78_vm1, %v412_v24, %v641_v6 }
 0xb18   :  { %645 = vst.msk [vmem:[%s1067_s7] sm:$0x3] %vm644_vm4, %v643_v52 }
 0xb19   :  { %650 = vsyncpa [#allocation3], 1 }

</bundles_post_ra>
